<compile_context>
chip_gen: v7x
topology: tpu7x:2x2x1
jax: 0.10.0
libtpu: 0.0.40
codegen_flags: <defaults>
</compile_context>

<pallas_src>
import functools

import jax
import jax.numpy as jnp
from jax.experimental import pallas as pl
from jax.experimental.pallas import tpu as pltpu


def _round_up(x, m):
    return ((x + m - 1) // m) * m


# ----------------------------------------------------------------------------
# Pallas kernel: tiled  out = act(X @ W + b)  with f32 accumulator scratch
# ----------------------------------------------------------------------------
def _matmul_bias_act_kernel(x_ref, w_ref, b_ref, o_ref, acc_ref, *, act):
    k = pl.program_id(2)

    @pl.when(k == 0)
    def _init():
        acc_ref[...] = jnp.zeros_like(acc_ref)

    acc_ref[...] += jnp.dot(
        x_ref[...], w_ref[...], preferred_element_type=jnp.float32
    )

    @pl.when(k == pl.num_programs(2) - 1)
    def _epilogue():
        acc = acc_ref[...] + b_ref[...]
        if act == "leaky_relu":
            acc = jnp.where(acc >= 0, acc, 0.2 * acc)
        elif act == "sigmoid":
            acc = 1.0 / (1.0 + jnp.exp(-acc))
        # act == "none": identity
        o_ref[...] = acc.astype(o_ref.dtype)


def matmul_bias_act(x, w, b, *, act="none", out_dtype=jnp.float32,
                    tm=256, tn=128, tk=512):
    """Fused tiled matmul + bias + activation on the MXU.

    x: (M, K), w: (K, N), b: (N,).  Inputs are cast to bf16, accumulation is
    f32.  M/N/K are zero-padded to tile multiples and the result is sliced
    back to (M, N).
    """
    M, K = x.shape
    K2, N = w.shape
    assert K == K2

    # K: pad to a 128-aligned width, single-block K if it fits in TK.
    Kp = _round_up(K, 128)
    tk_eff = min(tk, Kp)
    Kp = _round_up(Kp, tk_eff)
    # N: pad to >=128 lanes (lane-dense stores even for tiny Cout).
    Np = _round_up(N, 128)
    tn_eff = min(tn, Np)
    Np = _round_up(Np, tn_eff)
    # M: pad to a sublane multiple, tile at <=tm.
    Mp = _round_up(M, 8)
    tm_eff = min(tm, Mp)
    Mp = _round_up(Mp, tm_eff)

    x_p = jnp.pad(x.astype(jnp.bfloat16), ((0, Mp - M), (0, Kp - K)))
    w_p = jnp.pad(w.astype(jnp.bfloat16), ((0, Kp - K), (0, Np - N)))
    b_p = jnp.pad(b.astype(jnp.float32), ((0, Np - N),)).reshape(1, Np)

    grid = (Mp // tm_eff, Np // tn_eff, Kp // tk_eff)

    cost = pl.CostEstimate(
        flops=2 * Mp * Kp * Np,
        transcendentals=Mp * Np if act == "sigmoid" else 0,
        bytes_accessed=(Mp * Kp + Kp * Np) * 2
        + Mp * Np * jnp.dtype(out_dtype).itemsize
        + Np * 4,
    )

    kernel = functools.partial(_matmul_bias_act_kernel, act=act)
    out = pl.pallas_call(
        kernel,
        out_shape=jax.ShapeDtypeStruct((Mp, Np), out_dtype),
        grid_spec=pltpu.PrefetchScalarGridSpec(
            num_scalar_prefetch=0,
            grid=grid,
            in_specs=[
                pl.BlockSpec((tm_eff, tk_eff), lambda i, j, k: (i, k)),
                pl.BlockSpec((tk_eff, tn_eff), lambda i, j, k: (k, j)),
                pl.BlockSpec((1, tn_eff), lambda i, j, k: (0, j)),
            ],
            out_specs=pl.BlockSpec((tm_eff, tn_eff), lambda i, j, k: (i, j)),
            scratch_shapes=[pltpu.VMEM((tm_eff, tn_eff), jnp.float32)],
        ),
        compiler_params=pltpu.CompilerParams(
            dimension_semantics=("parallel", "parallel", "arbitrary"),
            vmem_limit_bytes=32 * 1024 * 1024,
        ),
        cost_estimate=cost,
    )(x_p, w_p, b_p)

    return out[:M, :N]


# ----------------------------------------------------------------------------
# Conv2d (k=4) lowered to im2col + Pallas matmul
# ----------------------------------------------------------------------------
def _im2col(x_nhwc, kh, kw, stride, padding):
    """Returns ((N*OH*OW, KH*KW*Cin) bf16 patches, OH, OW)."""
    n, h, w, cin = x_nhwc.shape
    oh = (h + 2 * padding - kh) // stride + 1
    ow = (w + 2 * padding - kw) // stride + 1
    xp = jnp.pad(
        x_nhwc.astype(jnp.bfloat16),
        ((0, 0), (padding, padding), (padding, padding), (0, 0)),
    )
    slices = []
    for ih in range(kh):
        for iw in range(kw):
            slices.append(
                xp[:, ih:ih + stride * oh:stride, iw:iw + stride * ow:stride, :]
            )
    patches = jnp.stack(slices, axis=3)          # (N, OH, OW, KH*KW, Cin)
    return patches.reshape(n * oh * ow, kh * kw * cin), oh, ow


def _w_to_mat(w_oihw):
    # (Cout, Cin, KH, KW) -> (KH, KW, Cin, Cout) -> (KH*KW*Cin, Cout)
    cout, cin, kh, kw = w_oihw.shape
    return jnp.transpose(w_oihw, (2, 3, 1, 0)).reshape(kh * kw * cin, cout)


def conv2d_pallas(x_nhwc, w_oihw, b, *, stride, padding, act,
                  out_dtype=jnp.bfloat16):
    n = x_nhwc.shape[0]
    cout, cin, kh, kw = w_oihw.shape
    assert cin == x_nhwc.shape[-1]
    patches, oh, ow = _im2col(x_nhwc, kh, kw, stride, padding)
    w_mat = _w_to_mat(w_oihw)
    out = matmul_bias_act(patches, w_mat, b, act=act, out_dtype=out_dtype)
    return out.reshape(n, oh, ow, cout)


# ----------------------------------------------------------------------------
# Discriminator parameters + forward
# ----------------------------------------------------------------------------
def init_discriminator_params(key, latent_dim, ndf, img_channels):
    def conv_init(k, cout, cin, ksz):
        kw_, kb_ = jax.random.split(k)
        w = 0.02 * jax.random.normal(kw_, (cout, cin, ksz, ksz), jnp.float32)
        b = 0.02 * jax.random.normal(kb_, (cout,), jnp.float32)
        return w, b

    k1, k2, k3, k4, k5 = jax.random.split(key, 5)
    return {
        "conv1": conv_init(k1, ndf, img_channels, 4),
        "conv2": conv_init(k2, ndf * 2, ndf, 4),
        "conv3": conv_init(k3, ndf * 4, ndf * 2, 4),
        "conv4": conv_init(k4, latent_dim, ndf * 4, 4),
        "dis":   conv_init(k5, 1, ndf * 4, 4),
    }


def discriminator_forward(params, x_nchw):
    """Mirrors Discriminator.forward. Input x_nchw: (N, C, H, W) float32.

    Returns (fc_enc, realfake):
      fc_enc:   (N, latent_dim * OH_head * OW_head)   (== (N, latent_dim) @32x32)
      realfake: (N * OH_head * OW_head,)              (== (N,) @32x32)
    """
    x = jnp.transpose(x_nchw, (0, 2, 3, 1))  # NCHW -> NHWC

    w1, b1 = params["conv1"]
    c1 = conv2d_pallas(x, w1, b1, stride=2, padding=1, act="leaky_relu")
    w2, b2 = params["conv2"]
    c2 = conv2d_pallas(c1, w2, b2, stride=2, padding=1, act="leaky_relu")
    w3, b3 = params["conv3"]
    c3 = conv2d_pallas(c2, w3, b3, stride=2, padding=1, act="leaky_relu")

    # Fused heads: conv4 (encoder) and dis share c3 and the same (k4,s2,p0)
    # geometry -> one matmul over weights concatenated along N.
    w4, b4 = params["conv4"]
    wd, bd = params["dis"]
    latent_dim = w4.shape[0]
    n = c3.shape[0]
    patches, oh, ow = _im2col(c3, 4, 4, 2, 0)
    w_mat = jnp.concatenate([_w_to_mat(w4), _w_to_mat(wd)], axis=1)
    b_cat = jnp.concatenate([b4, bd], axis=0)
    head = matmul_bias_act(patches, w_mat, b_cat, act="none",
                           out_dtype=jnp.float32)
    head = head.reshape(n, oh, ow, latent_dim + 1)

    enc = head[..., :latent_dim]                         # (N, OH, OW, latent)
    dis = head[..., latent_dim]                          # (N, OH, OW)
    # Match PyTorch NCHW flatten ordering.
    fc_enc = jnp.transpose(enc, (0, 3, 1, 2)).reshape(n, -1)
    realfake = jax.nn.sigmoid(dis.reshape(-1))           # view(-1,1).squeeze(1)
    return fc_enc, realfake


# ----------------------------------------------------------------------------
# Pure-JAX f32 reference (sanity check only)
# ----------------------------------------------------------------------------
def _ref_conv(x_nchw, w, b, stride, padding):
    out = jax.lax.conv_general_dilated(
        x_nchw, w, window_strides=(stride, stride),
        padding=[(padding, padding), (padding, padding)],
        dimension_numbers=("NCHW", "OIHW", "NCHW"))
    return out + b.reshape(1, -1, 1, 1)


def discriminator_reference(params, x_nchw):
    lrelu = lambda v: jnp.where(v >= 0, v, 0.2 * v)
    c1 = lrelu(_ref_conv(x_nchw, *params["conv1"], 2, 1))
    c2 = lrelu(_ref_conv(c1, *params["conv2"], 2, 1))
    c3 = lrelu(_ref_conv(c2, *params["conv3"], 2, 1))
    dis = jax.nn.sigmoid(_ref_conv(c3, *params["dis"], 2, 0))
    enc = _ref_conv(c3, *params["conv4"], 2, 0)
    return enc.reshape(enc.shape[0], -1), dis.reshape(-1)


# ----------------------------------------------------------------------------
if __name__ == "__main__":
    # 32x32 RGB images so the final k=4/s=2/p=0 head convs see a 4x4 feature
    # map (exactly one output pixel), matching the module's intended use.
    batch, img_channels, H, W = 2, 3, 32, 32
    ndf, latent_dim = 8, 16

    key = jax.random.PRNGKey(0)
    k_params, k_input = jax.random.split(key)
    params = init_discriminator_params(k_params, latent_dim, ndf, img_channels)
    x = jax.random.normal(k_input, (batch, img_channels, H, W), jnp.float32)

    fwd = jax.jit(discriminator_forward)
    fc_enc, realfake = fwd(params, x)
    fc_enc = jax.block_until_ready(fc_enc)
    realfake = jax.block_until_ready(realfake)

    assert fc_enc.shape == (batch, latent_dim)
    assert realfake.shape == (batch,)

    # Sanity check against a pure-JAX f32 reference (bf16 path -> loose tol).
    ref_enc, ref_rf = discriminator_reference(params, x)
    assert jnp.allclose(fc_enc, ref_enc, atol=2e-2, rtol=2e-2)
    assert jnp.allclose(realfake, ref_rf, atol=2e-2, rtol=2e-2)

    print("KERNEL_OK")
</pallas_src>

<mosaic_0001>
module attributes {stable_mosaic.version = 11 : i64} {
  func.func @_matmul_bias_act_kernel(%arg0: i32, %arg1: i32, %arg2: i32, %arg3: memref<256x128xbf16, #tpu.memory_space<vmem>>, %arg4: memref<128x128xbf16, #tpu.memory_space<vmem>>, %arg5: memref<1x128xf32, #tpu.memory_space<vmem>>, %arg6: memref<256x128xbf16, #tpu.memory_space<vmem>>, %arg7: memref<256x128xf32, #tpu.memory_space<vmem>>) attributes {dimension_semantics = [#tpu.dimension_semantics<parallel>, #tpu.dimension_semantics<parallel>, #tpu.dimension_semantics<arbitrary>], iteration_bounds = array<i64: 2, 1, 1>, scalar_prefetch = 0 : i64, scratch_operands = 1 : i64, tpu.core_type = #tpu.core_type<tc>, window_params = [{transform_indices = @transform_0, window_bounds = array<i64: 256, 128>}, {transform_indices = @transform_1, window_bounds = array<i64: 128, 128>}, {transform_indices = @transform_2, window_bounds = array<i64: 1, 128>}, {transform_indices = @transform_3, window_bounds = array<i64: 256, 128>}]} {
    %c0_i32 = arith.constant 0 : i32
    %0 = arith.cmpi eq, %arg2, %c0_i32 : i32
    %1 = arith.extui %0 : i1 to i32
    %c0_i32_0 = arith.constant 0 : i32
    %2 = arith.cmpi ne, %1, %c0_i32_0 : i32
    scf.if %2 {
      %cst_10 = arith.constant 0.000000e+00 : f32
      %12 = vector.broadcast %cst_10 : f32 to vector<256x128xf32>
      %c0_11 = arith.constant 0 : index
      %c0_12 = arith.constant 0 : index
      %13 = vector.load %arg7[%c0_11, %c0_12] : memref<256x128xf32, #tpu.memory_space<vmem>>, vector<256x128xf32>
      tpu.vector_store %arg7[%c0_11, %c0_12], %12 {strides = array<i32>} : memref<256x128xf32, #tpu.memory_space<vmem>>, vector<256x128xf32>,
    } else {
    }
    %c0 = arith.constant 0 : index
    %c0_1 = arith.constant 0 : index
    %3 = vector.load %arg7[%c0, %c0_1] : memref<256x128xf32, #tpu.memory_space<vmem>>, vector<256x128xf32>
    %c0_2 = arith.constant 0 : index
    %c0_3 = arith.constant 0 : index
    %4 = vector.load %arg3[%c0_2, %c0_3] : memref<256x128xbf16, #tpu.memory_space<vmem>>, vector<256x128xbf16>
    %c0_4 = arith.constant 0 : index
    %c0_5 = arith.constant 0 : index
    %5 = vector.load %arg4[%c0_4, %c0_5] : memref<128x128xbf16, #tpu.memory_space<vmem>>, vector<128x128xbf16>
    %cst = arith.constant dense<0.000000e+00> : vector<256x128xf32>
    %6 = tpu.matmul %4, %5, %cst {dimension_numbers = #tpu.dot_dimension_numbers<[1], [0], [0], [1], [0, 0, 1, 1], [], []>} : vector<256x128xbf16>, vector<128x128xbf16>, vector<256x128xf32> -> vector<256x128xf32>
    %7 = arith.addf %3, %6 : vector<256x128xf32>
    %c0_6 = arith.constant 0 : index
    %c0_7 = arith.constant 0 : index
    %8 = vector.load %arg7[%c0_6, %c0_7] : memref<256x128xf32, #tpu.memory_space<vmem>>, vector<256x128xf32>
    tpu.vector_store %arg7[%c0_6, %c0_7], %7 {strides = array<i32>} : memref<256x128xf32, #tpu.memory_space<vmem>>, vector<256x128xf32>,
    %c0_i32_8 = arith.constant 0 : i32
    %9 = arith.cmpi eq, %arg2, %c0_i32_8 : i32
    %10 = arith.extui %9 : i1 to i32
    %c0_i32_9 = arith.constant 0 : i32
    %11 = arith.cmpi ne, %10, %c0_i32_9 : i32
    scf.if %11 {
      %c0_10 = arith.constant 0 : index
      %c0_11 = arith.constant 0 : index
      %12 = vector.load %arg7[%c0_10, %c0_11] : memref<256x128xf32, #tpu.memory_space<vmem>>, vector<256x128xf32>
      %c0_12 = arith.constant 0 : index
      %c0_13 = arith.constant 0 : index
      %13 = vector.load %arg5[%c0_12, %c0_13] : memref<1x128xf32, #tpu.memory_space<vmem>>, vector<1x128xf32>
      %14 = vector.broadcast %13 : vector<1x128xf32> to vector<256x128xf32>
      %15 = arith.addf %12, %14 : vector<256x128xf32>
      %cst_14 = arith.constant 0.000000e+00 : f32
      %16 = vector.broadcast %cst_14 : f32 to vector<256x128xf32>
      %17 = arith.cmpf oge, %15, %16 : vector<256x128xf32>
      %cst_15 = arith.constant 2.000000e-01 : f32
      %18 = vector.broadcast %cst_15 : f32 to vector<256x128xf32>
      %19 = arith.mulf %18, %15 : vector<256x128xf32>
      %20 = arith.select %17, %15, %19 : vector<256x128xi1>, vector<256x128xf32>
      %21 = arith.truncf %20 : vector<256x128xf32> to vector<256x128xbf16>
      %c0_16 = arith.constant 0 : index
      %c0_17 = arith.constant 0 : index
      %22 = vector.load %arg6[%c0_16, %c0_17] : memref<256x128xbf16, #tpu.memory_space<vmem>>, vector<256x128xbf16>
      tpu.vector_store %arg6[%c0_16, %c0_17], %21 {strides = array<i32>} : memref<256x128xbf16, #tpu.memory_space<vmem>>, vector<256x128xbf16>,
    } else {
    }
    return
  }
  func.func @transform_0(%arg0: i32, %arg1: i32, %arg2: i32) -> (i32, i32) {
    %c0_i32 = arith.constant 0 : i32
    return %arg0, %arg2 : i32, i32
  }
  func.func @transform_1(%arg0: i32, %arg1: i32, %arg2: i32) -> (i32, i32) {
    %c0_i32 = arith.constant 0 : i32
    return %arg2, %arg1 : i32, i32
  }
  func.func @transform_2(%arg0: i32, %arg1: i32, %arg2: i32) -> (i32, i32) {
    %c0_i32 = arith.constant 0 : i32
    %c0_i32_0 = arith.constant 0 : i32
    return %c0_i32, %arg1 : i32, i32
  }
  func.func @transform_3(%arg0: i32, %arg1: i32, %arg2: i32) -> (i32, i32) {
    %c0_i32 = arith.constant 0 : i32
    return %arg0, %arg1 : i32, i32
  }
}

module attributes {stable_mosaic.version = 11 : i64} {
  func.func @_matmul_bias_act_kernel(%arg0: i32, %arg1: i32, %arg2: i32, %arg3: memref<128x128xbf16, #tpu.memory_space<vmem>>, %arg4: memref<128x128xbf16, #tpu.memory_space<vmem>>, %arg5: memref<1x128xf32, #tpu.memory_space<vmem>>, %arg6: memref<128x128xbf16, #tpu.memory_space<vmem>>, %arg7: memref<128x128xf32, #tpu.memory_space<vmem>>) attributes {dimension_semantics = [#tpu.dimension_semantics<parallel>, #tpu.dimension_semantics<parallel>, #tpu.dimension_semantics<arbitrary>], iteration_bounds = array<i64: 1, 1, 1>, scalar_prefetch = 0 : i64, scratch_operands = 1 : i64, tpu.core_type = #tpu.core_type<tc>, window_params = [{transform_indices = @transform_0, window_bounds = array<i64: 128, 128>}, {transform_indices = @transform_1, window_bounds = array<i64: 128, 128>}, {transform_indices = @transform_2, window_bounds = array<i64: 1, 128>}, {transform_indices = @transform_3, window_bounds = array<i64: 128, 128>}]} {
    %c0_i32 = arith.constant 0 : i32
    %0 = arith.cmpi eq, %arg2, %c0_i32 : i32
    %1 = arith.extui %0 : i1 to i32
    %c0_i32_0 = arith.constant 0 : i32
    %2 = arith.cmpi ne, %1, %c0_i32_0 : i32
    scf.if %2 {
      %cst_10 = arith.constant 0.000000e+00 : f32
      %12 = vector.broadcast %cst_10 : f32 to vector<128x128xf32>
      %c0_11 = arith.constant 0 : index
      %c0_12 = arith.constant 0 : index
      %13 = vector.load %arg7[%c0_11, %c0_12] : memref<128x128xf32, #tpu.memory_space<vmem>>, vector<128x128xf32>
      tpu.vector_store %arg7[%c0_11, %c0_12], %12 {strides = array<i32>} : memref<128x128xf32, #tpu.memory_space<vmem>>, vector<128x128xf32>,
    } else {
    }
    %c0 = arith.constant 0 : index
    %c0_1 = arith.constant 0 : index
    %3 = vector.load %arg7[%c0, %c0_1] : memref<128x128xf32, #tpu.memory_space<vmem>>, vector<128x128xf32>
    %c0_2 = arith.constant 0 : index
    %c0_3 = arith.constant 0 : index
    %4 = vector.load %arg3[%c0_2, %c0_3] : memref<128x128xbf16, #tpu.memory_space<vmem>>, vector<128x128xbf16>
    %c0_4 = arith.constant 0 : index
    %c0_5 = arith.constant 0 : index
    %5 = vector.load %arg4[%c0_4, %c0_5] : memref<128x128xbf16, #tpu.memory_space<vmem>>, vector<128x128xbf16>
    %cst = arith.constant dense<0.000000e+00> : vector<128x128xf32>
    %6 = tpu.matmul %4, %5, %cst {dimension_numbers = #tpu.dot_dimension_numbers<[1], [0], [0], [1], [0, 0, 1, 1], [], []>} : vector<128x128xbf16>, vector<128x128xbf16>, vector<128x128xf32> -> vector<128x128xf32>
    %7 = arith.addf %3, %6 : vector<128x128xf32>
    %c0_6 = arith.constant 0 : index
    %c0_7 = arith.constant 0 : index
    %8 = vector.load %arg7[%c0_6, %c0_7] : memref<128x128xf32, #tpu.memory_space<vmem>>, vector<128x128xf32>
    tpu.vector_store %arg7[%c0_6, %c0_7], %7 {strides = array<i32>} : memref<128x128xf32, #tpu.memory_space<vmem>>, vector<128x128xf32>,
    %c0_i32_8 = arith.constant 0 : i32
    %9 = arith.cmpi eq, %arg2, %c0_i32_8 : i32
    %10 = arith.extui %9 : i1 to i32
    %c0_i32_9 = arith.constant 0 : i32
    %11 = arith.cmpi ne, %10, %c0_i32_9 : i32
    scf.if %11 {
      %c0_10 = arith.constant 0 : index
      %c0_11 = arith.constant 0 : index
      %12 = vector.load %arg7[%c0_10, %c0_11] : memref<128x128xf32, #tpu.memory_space<vmem>>, vector<128x128xf32>
      %c0_12 = arith.constant 0 : index
      %c0_13 = arith.constant 0 : index
      %13 = vector.load %arg5[%c0_12, %c0_13] : memref<1x128xf32, #tpu.memory_space<vmem>>, vector<1x128xf32>
      %14 = vector.broadcast %13 : vector<1x128xf32> to vector<128x128xf32>
      %15 = arith.addf %12, %14 : vector<128x128xf32>
      %cst_14 = arith.constant 0.000000e+00 : f32
      %16 = vector.broadcast %cst_14 : f32 to vector<128x128xf32>
      %17 = arith.cmpf oge, %15, %16 : vector<128x128xf32>
      %cst_15 = arith.constant 2.000000e-01 : f32
      %18 = vector.broadcast %cst_15 : f32 to vector<128x128xf32>
      %19 = arith.mulf %18, %15 : vector<128x128xf32>
      %20 = arith.select %17, %15, %19 : vector<128x128xi1>, vector<128x128xf32>
      %21 = arith.truncf %20 : vector<128x128xf32> to vector<128x128xbf16>
      %c0_16 = arith.constant 0 : index
      %c0_17 = arith.constant 0 : index
      %22 = vector.load %arg6[%c0_16, %c0_17] : memref<128x128xbf16, #tpu.memory_space<vmem>>, vector<128x128xbf16>
      tpu.vector_store %arg6[%c0_16, %c0_17], %21 {strides = array<i32>} : memref<128x128xbf16, #tpu.memory_space<vmem>>, vector<128x128xbf16>,
    } else {
    }
    return
  }
  func.func @transform_0(%arg0: i32, %arg1: i32, %arg2: i32) -> (i32, i32) {
    %c0_i32 = arith.constant 0 : i32
    return %arg0, %arg2 : i32, i32
  }
  func.func @transform_1(%arg0: i32, %arg1: i32, %arg2: i32) -> (i32, i32) {
    %c0_i32 = arith.constant 0 : i32
    return %arg2, %arg1 : i32, i32
  }
  func.func @transform_2(%arg0: i32, %arg1: i32, %arg2: i32) -> (i32, i32) {
    %c0_i32 = arith.constant 0 : i32
    %c0_i32_0 = arith.constant 0 : i32
    return %c0_i32, %arg1 : i32, i32
  }
  func.func @transform_3(%arg0: i32, %arg1: i32, %arg2: i32) -> (i32, i32) {
    %c0_i32 = arith.constant 0 : i32
    return %arg0, %arg1 : i32, i32
  }
}

module attributes {stable_mosaic.version = 11 : i64} {
  func.func @_matmul_bias_act_kernel(%arg0: i32, %arg1: i32, %arg2: i32, %arg3: memref<32x256xbf16, #tpu.memory_space<vmem>>, %arg4: memref<256x128xbf16, #tpu.memory_space<vmem>>, %arg5: memref<1x128xf32, #tpu.memory_space<vmem>>, %arg6: memref<32x128xbf16, #tpu.memory_space<vmem>>, %arg7: memref<32x128xf32, #tpu.memory_space<vmem>>) attributes {dimension_semantics = [#tpu.dimension_semantics<parallel>, #tpu.dimension_semantics<parallel>, #tpu.dimension_semantics<arbitrary>], iteration_bounds = array<i64: 1, 1, 1>, scalar_prefetch = 0 : i64, scratch_operands = 1 : i64, tpu.core_type = #tpu.core_type<tc>, window_params = [{transform_indices = @transform_0, window_bounds = array<i64: 32, 256>}, {transform_indices = @transform_1, window_bounds = array<i64: 256, 128>}, {transform_indices = @transform_2, window_bounds = array<i64: 1, 128>}, {transform_indices = @transform_3, window_bounds = array<i64: 32, 128>}]} {
    %c0_i32 = arith.constant 0 : i32
    %0 = arith.cmpi eq, %arg2, %c0_i32 : i32
    %1 = arith.extui %0 : i1 to i32
    %c0_i32_0 = arith.constant 0 : i32
    %2 = arith.cmpi ne, %1, %c0_i32_0 : i32
    scf.if %2 {
      %cst_10 = arith.constant 0.000000e+00 : f32
      %12 = vector.broadcast %cst_10 : f32 to vector<32x128xf32>
      %c0_11 = arith.constant 0 : index
      %c0_12 = arith.constant 0 : index
      %13 = vector.load %arg7[%c0_11, %c0_12] : memref<32x128xf32, #tpu.memory_space<vmem>>, vector<32x128xf32>
      tpu.vector_store %arg7[%c0_11, %c0_12], %12 {strides = array<i32>} : memref<32x128xf32, #tpu.memory_space<vmem>>, vector<32x128xf32>,
    } else {
    }
    %c0 = arith.constant 0 : index
    %c0_1 = arith.constant 0 : index
    %3 = vector.load %arg7[%c0, %c0_1] : memref<32x128xf32, #tpu.memory_space<vmem>>, vector<32x128xf32>
    %c0_2 = arith.constant 0 : index
    %c0_3 = arith.constant 0 : index
    %4 = vector.load %arg3[%c0_2, %c0_3] : memref<32x256xbf16, #tpu.memory_space<vmem>>, vector<32x256xbf16>
    %c0_4 = arith.constant 0 : index
    %c0_5 = arith.constant 0 : index
    %5 = vector.load %arg4[%c0_4, %c0_5] : memref<256x128xbf16, #tpu.memory_space<vmem>>, vector<256x128xbf16>
    %cst = arith.constant dense<0.000000e+00> : vector<32x128xf32>
    %6 = tpu.matmul %4, %5, %cst {dimension_numbers = #tpu.dot_dimension_numbers<[1], [0], [0], [1], [0, 0, 1, 1], [], []>} : vector<32x256xbf16>, vector<256x128xbf16>, vector<32x128xf32> -> vector<32x128xf32>
    %7 = arith.addf %3, %6 : vector<32x128xf32>
    %c0_6 = arith.constant 0 : index
    %c0_7 = arith.constant 0 : index
    %8 = vector.load %arg7[%c0_6, %c0_7] : memref<32x128xf32, #tpu.memory_space<vmem>>, vector<32x128xf32>
    tpu.vector_store %arg7[%c0_6, %c0_7], %7 {strides = array<i32>} : memref<32x128xf32, #tpu.memory_space<vmem>>, vector<32x128xf32>,
    %c0_i32_8 = arith.constant 0 : i32
    %9 = arith.cmpi eq, %arg2, %c0_i32_8 : i32
    %10 = arith.extui %9 : i1 to i32
    %c0_i32_9 = arith.constant 0 : i32
    %11 = arith.cmpi ne, %10, %c0_i32_9 : i32
    scf.if %11 {
      %c0_10 = arith.constant 0 : index
      %c0_11 = arith.constant 0 : index
      %12 = vector.load %arg7[%c0_10, %c0_11] : memref<32x128xf32, #tpu.memory_space<vmem>>, vector<32x128xf32>
      %c0_12 = arith.constant 0 : index
      %c0_13 = arith.constant 0 : index
      %13 = vector.load %arg5[%c0_12, %c0_13] : memref<1x128xf32, #tpu.memory_space<vmem>>, vector<1x128xf32>
      %14 = vector.broadcast %13 : vector<1x128xf32> to vector<32x128xf32>
      %15 = arith.addf %12, %14 : vector<32x128xf32>
      %cst_14 = arith.constant 0.000000e+00 : f32
      %16 = vector.broadcast %cst_14 : f32 to vector<32x128xf32>
      %17 = arith.cmpf oge, %15, %16 : vector<32x128xf32>
      %cst_15 = arith.constant 2.000000e-01 : f32
      %18 = vector.broadcast %cst_15 : f32 to vector<32x128xf32>
      %19 = arith.mulf %18, %15 : vector<32x128xf32>
      %20 = arith.select %17, %15, %19 : vector<32x128xi1>, vector<32x128xf32>
      %21 = arith.truncf %20 : vector<32x128xf32> to vector<32x128xbf16>
      %c0_16 = arith.constant 0 : index
      %c0_17 = arith.constant 0 : index
      %22 = vector.load %arg6[%c0_16, %c0_17] : memref<32x128xbf16, #tpu.memory_space<vmem>>, vector<32x128xbf16>
      tpu.vector_store %arg6[%c0_16, %c0_17], %21 {strides = array<i32>} : memref<32x128xbf16, #tpu.memory_space<vmem>>, vector<32x128xbf16>,
    } else {
    }
    return
  }
  func.func @transform_0(%arg0: i32, %arg1: i32, %arg2: i32) -> (i32, i32) {
    %c0_i32 = arith.constant 0 : i32
    return %arg0, %arg2 : i32, i32
  }
  func.func @transform_1(%arg0: i32, %arg1: i32, %arg2: i32) -> (i32, i32) {
    %c0_i32 = arith.constant 0 : i32
    return %arg2, %arg1 : i32, i32
  }
  func.func @transform_2(%arg0: i32, %arg1: i32, %arg2: i32) -> (i32, i32) {
    %c0_i32 = arith.constant 0 : i32
    %c0_i32_0 = arith.constant 0 : i32
    return %c0_i32, %arg1 : i32, i32
  }
  func.func @transform_3(%arg0: i32, %arg1: i32, %arg2: i32) -> (i32, i32) {
    %c0_i32 = arith.constant 0 : i32
    return %arg0, %arg1 : i32, i32
  }
}

module attributes {stable_mosaic.version = 11 : i64} {
  func.func @_matmul_bias_act_kernel(%arg0: i32, %arg1: i32, %arg2: i32, %arg3: memref<8x512xbf16, #tpu.memory_space<vmem>>, %arg4: memref<512x128xbf16, #tpu.memory_space<vmem>>, %arg5: memref<1x128xf32, #tpu.memory_space<vmem>>, %arg6: memref<8x128xf32, #tpu.memory_space<vmem>>, %arg7: memref<8x128xf32, #tpu.memory_space<vmem>>) attributes {dimension_semantics = [#tpu.dimension_semantics<parallel>, #tpu.dimension_semantics<parallel>, #tpu.dimension_semantics<arbitrary>], iteration_bounds = array<i64: 1, 1, 1>, scalar_prefetch = 0 : i64, scratch_operands = 1 : i64, tpu.core_type = #tpu.core_type<tc>, window_params = [{transform_indices = @transform_0, window_bounds = array<i64: 8, 512>}, {transform_indices = @transform_1, window_bounds = array<i64: 512, 128>}, {transform_indices = @transform_2, window_bounds = array<i64: 1, 128>}, {transform_indices = @transform_3, window_bounds = array<i64: 8, 128>}]} {
    %c0_i32 = arith.constant 0 : i32
    %0 = arith.cmpi eq, %arg2, %c0_i32 : i32
    %1 = arith.extui %0 : i1 to i32
    %c0_i32_0 = arith.constant 0 : i32
    %2 = arith.cmpi ne, %1, %c0_i32_0 : i32
    scf.if %2 {
      %cst_10 = arith.constant 0.000000e+00 : f32
      %12 = vector.broadcast %cst_10 : f32 to vector<8x128xf32>
      %c0_11 = arith.constant 0 : index
      %c0_12 = arith.constant 0 : index
      %13 = vector.load %arg7[%c0_11, %c0_12] : memref<8x128xf32, #tpu.memory_space<vmem>>, vector<8x128xf32>
      tpu.vector_store %arg7[%c0_11, %c0_12], %12 {strides = array<i32>} : memref<8x128xf32, #tpu.memory_space<vmem>>, vector<8x128xf32>,
    } else {
    }
    %c0 = arith.constant 0 : index
    %c0_1 = arith.constant 0 : index
    %3 = vector.load %arg7[%c0, %c0_1] : memref<8x128xf32, #tpu.memory_space<vmem>>, vector<8x128xf32>
    %c0_2 = arith.constant 0 : index
    %c0_3 = arith.constant 0 : index
    %4 = vector.load %arg3[%c0_2, %c0_3] : memref<8x512xbf16, #tpu.memory_space<vmem>>, vector<8x512xbf16>
    %c0_4 = arith.constant 0 : index
    %c0_5 = arith.constant 0 : index
    %5 = vector.load %arg4[%c0_4, %c0_5] : memref<512x128xbf16, #tpu.memory_space<vmem>>, vector<512x128xbf16>
    %cst = arith.constant dense<0.000000e+00> : vector<8x128xf32>
    %6 = tpu.matmul %4, %5, %cst {dimension_numbers = #tpu.dot_dimension_numbers<[1], [0], [0], [1], [0, 0, 1, 1], [], []>} : vector<8x512xbf16>, vector<512x128xbf16>, vector<8x128xf32> -> vector<8x128xf32>
    %7 = arith.addf %3, %6 : vector<8x128xf32>
    %c0_6 = arith.constant 0 : index
    %c0_7 = arith.constant 0 : index
    %8 = vector.load %arg7[%c0_6, %c0_7] : memref<8x128xf32, #tpu.memory_space<vmem>>, vector<8x128xf32>
    tpu.vector_store %arg7[%c0_6, %c0_7], %7 {strides = array<i32>} : memref<8x128xf32, #tpu.memory_space<vmem>>, vector<8x128xf32>,
    %c0_i32_8 = arith.constant 0 : i32
    %9 = arith.cmpi eq, %arg2, %c0_i32_8 : i32
    %10 = arith.extui %9 : i1 to i32
    %c0_i32_9 = arith.constant 0 : i32
    %11 = arith.cmpi ne, %10, %c0_i32_9 : i32
    scf.if %11 {
      %c0_10 = arith.constant 0 : index
      %c0_11 = arith.constant 0 : index
      %12 = vector.load %arg7[%c0_10, %c0_11] : memref<8x128xf32, #tpu.memory_space<vmem>>, vector<8x128xf32>
      %c0_12 = arith.constant 0 : index
      %c0_13 = arith.constant 0 : index
      %13 = vector.load %arg5[%c0_12, %c0_13] : memref<1x128xf32, #tpu.memory_space<vmem>>, vector<1x128xf32>
      %14 = vector.broadcast %13 : vector<1x128xf32> to vector<8x128xf32>
      %15 = arith.addf %12, %14 : vector<8x128xf32>
      %c0_14 = arith.constant 0 : index
      %c0_15 = arith.constant 0 : index
      %16 = vector.load %arg6[%c0_14, %c0_15] : memref<8x128xf32, #tpu.memory_space<vmem>>, vector<8x128xf32>
      tpu.vector_store %arg6[%c0_14, %c0_15], %15 {strides = array<i32>} : memref<8x128xf32, #tpu.memory_space<vmem>>, vector<8x128xf32>,
    } else {
    }
    return
  }
  func.func @transform_0(%arg0: i32, %arg1: i32, %arg2: i32) -> (i32, i32) {
    %c0_i32 = arith.constant 0 : i32
    return %arg0, %arg2 : i32, i32
  }
  func.func @transform_1(%arg0: i32, %arg1: i32, %arg2: i32) -> (i32, i32) {
    %c0_i32 = arith.constant 0 : i32
    return %arg2, %arg1 : i32, i32
  }
  func.func @transform_2(%arg0: i32, %arg1: i32, %arg2: i32) -> (i32, i32) {
    %c0_i32 = arith.constant 0 : i32
    %c0_i32_0 = arith.constant 0 : i32
    return %c0_i32, %arg1 : i32, i32
  }
  func.func @transform_3(%arg0: i32, %arg1: i32, %arg2: i32) -> (i32, i32) {
    %c0_i32 = arith.constant 0 : i32
    return %arg0, %arg1 : i32, i32
  }
}

</mosaic_0001>

<bundles_post_ra>
// kernel: discriminator_forward.4
= control target key start
LH: loop header
LB: loop body
LE: loop exit
PB: predicated region body
PF: predicated region fallthrough
CT: control target
= control target key end

     0   :  { %s1563_s12 = smov 0   ;;  %s1565_s13 = smov 0   ;;  %s1706_s0 = inlined_call_operand.vmem [shape: bf16[512,128], index: 0, kind: input, shape index: {}]   ;;  %s1707_s1 = inlined_call_operand.vmem [shape: bf16[128,128], index: 1, kind: input, shape index: {}]   ;;  %s1708_s2 = inlined_call_operand.vmem [shape: f32[1,128], index: 2, kind: input, shape index: {}]   ;;  %s1709_s3 = inlined_call_operand.vmem [shape: bf16[512,128], index: 3, kind: output, shape index: {}]  }
   0x1   :  { %s1567_s14 = smov 0  }
   0x2 LB: > { %s32_s15 = sadd.s32 1, %s1537_s13  ;;  %p1192_p0 = scmp.ge.s32.totalorder %s1541_s14, 1  ;;  %s1541_s14 = sphi %s1567_s14, %s13_s14   ;;  %s1537_s13 = sphi %s1565_s13, %s1711_s13   ;;  %s1533_s12 = sphi %s1563_s12, %s1710_s12  }
   0x3   : > { %p34_p1 = scmp.ge.s32.totalorder %s32_s15, 2  ;;  %p188_p2 = scmp.lt.s32.totalorder %s1541_s14, 3 }
   0x5   : > { %s1713_s15 = smov (%p34_p1, %s32_s15), 0  ;;  %p189_p3 = pnand %p1192_p0, %p188_p2 }
   0x6   : > { %v1495_v0 = vld [vmem:[%s1707_s1] sm:$0xff] (!%p189_p3)   ;;  %s1193_s18 = sshll.u32 (!%p189_p3), %s1533_s12, 5  ;;  %v1496_v1 = vld [vmem:[%s1707_s1 + $0x8] sm:$0xff] (!%p189_p3)   ;;  %v1497_v2 = vld [vmem:[%s1707_s1 + $0x10] sm:$0xff] (!%p189_p3)  }
   0x7   : > { %192 = sbr.rel (%p189_p3) target bundleno = 294 (0x126), region = 32  ;;  %p230_p4 = scmp.lt.s32.totalorder (!%p189_p3), %s1193_s18, 63  ;;  %1407 = vmatprep.subr.bf16.mxu0 (!%p189_p3), %v1495_v0  ;;  %1455 = vmatprep.subr.bf16.mxu1 (!%p189_p3), %v1495_v0  ;;  %v1498_v3 = vld [vmem:[%s1707_s1 + $0x18] sm:$0xff] (!%p189_p3)   ;;  %v1499_v6 = vld [vmem:[%s1707_s1 + $0x20] sm:$0xff] (!%p189_p3)   ;;  %v1500_v7 = vld [vmem:[%s1707_s1 + $0x28] sm:$0xff] (!%p189_p3)  }
   0x8   : > { %1408 = vmatpush3.bf16.msra.mxu0 (!%p189_p3), %v1495_v0  ;;  %1463 = vmatpush3.bf16.msra.mxu1 (!%p189_p3), %v1495_v0  ;;  %v1501_v8 = vld [vmem:[%s1707_s1 + $0x30] sm:$0xff] (!%p189_p3)   ;;  %v1502_v9 = vld [vmem:[%s1707_s1 + $0x38] sm:$0xff] (!%p189_p3)   ;;  %v1634_v24 = vld [vmem:[%s1708_s2] ss:$0 sm:$0xff] (!%p189_p3) }
   0x9   : > { %1409 = vmatprep.subr.bf16.mxu0 (!%p189_p3), %v1496_v1  ;;  %1456 = vmatprep.subr.bf16.mxu1 (!%p189_p3), %v1496_v1 }
   0xc   : > { %1410 = vmatpush3.bf16.msra.mxu0 (!%p189_p3), %v1496_v1  ;;  %1464 = vmatpush3.bf16.msra.mxu1 (!%p189_p3), %v1496_v1 }
   0xd   : > { %1411 = vmatprep.subr.bf16.mxu0 (!%p189_p3), %v1497_v2  ;;  %1457 = vmatprep.subr.bf16.mxu1 (!%p189_p3), %v1497_v2 }
   0xe   : > { %s1715_s18 = smov (!%p230_p4, %s1193_s18), 63 }
   0xf   : > { %s1194_s23 = sshll.u32 %s1715_s18, 2 }
  0x10   : > { %s1598_s26 = scalar_lea.vmem %s1706_s0, %s1194_s23  ;;  %1412 = vmatpush3.bf16.msra.mxu0 %v1497_v2  ;;  %1465 = vmatpush3.bf16.msra.mxu1 %v1497_v2  ;;  %s1651_s17 = scalar_lea.vmem %s1709_s3, %s1194_s23 }
  0x11   : > { %v1503_v4 = vld [vmem:[%s1598_s26] sm:$0xff]   ;;  %1413 = vmatprep.subr.bf16.mxu0 %v1498_v3  ;;  %1458 = vmatprep.subr.bf16.mxu1 %v1498_v3  ;;  %v1505_v10 = vld [vmem:[%s1598_s26 + $0x8] sm:$0xff]   ;;  %v1507_v12 = vld [vmem:[%s1598_s26 + $0x10] sm:$0xff]  }
  0x12   : > { %v1504_v5 = vld [vmem:[%s1598_s26 + $0x40] sm:$0xff]   ;;  %1423 = vmatprep.mubr.bf16.mxu0 %v1503_v4  ;;  %v1506_v11 = vld [vmem:[%s1598_s26 + $0x48] sm:$0xff]   ;;  %v1508_v13 = vld [vmem:[%s1598_s26 + $0x50] sm:$0xff]  }
  0x13   : > { %1439 = vmatprep.mubr.bf16.mxu1 %v1504_v5  ;;  %v1509_v14 = vld [vmem:[%s1598_s26 + $0x18] sm:$0xff]   ;;  %v1511_v16 = vld [vmem:[%s1598_s26 + $0x20] sm:$0xff]   ;;  %v1513_v18 = vld [vmem:[%s1598_s26 + $0x28] sm:$0xff]  }
  0x14   : > { %1414 = vmatpush3.bf16.msra.mxu0 %v1498_v3  ;;  %1466 = vmatpush3.bf16.msra.mxu1 %v1498_v3  ;;  %v1510_v15 = vld [vmem:[%s1598_s26 + $0x58] sm:$0xff]   ;;  %v1512_v17 = vld [vmem:[%s1598_s26 + $0x60] sm:$0xff]   ;;  %v1514_v19 = vld [vmem:[%s1598_s26 + $0x68] sm:$0xff]  }
  0x15   : > { %1415 = vmatprep.subr.bf16.mxu0 %v1499_v6  ;;  %1459 = vmatprep.subr.bf16.mxu1 %v1499_v6  ;;  %v1515_v20 = vld [vmem:[%s1598_s26 + $0x30] sm:$0xff]   ;;  %v1517_v22 = vld [vmem:[%s1598_s26 + $0x38] sm:$0xff]  }
  0x16   : > { %v1516_v21 = vld [vmem:[%s1598_s26 + $0x70] sm:$0xff]   ;;  %v1518_v23 = vld [vmem:[%s1598_s26 + $0x78] sm:$0xff]  }
  0x18   : > { %1416 = vmatpush3.bf16.msra.mxu0 %v1499_v6  ;;  %1467 = vmatpush3.bf16.msra.mxu1 %v1499_v6 }
  0x19   : > { %1417 = vmatprep.subr.bf16.mxu0 %v1500_v7  ;;  %1460 = vmatprep.subr.bf16.mxu1 %v1500_v7 }
  0x1c   : > { %1418 = vmatpush3.bf16.msra.mxu0 %v1500_v7  ;;  %1468 = vmatpush3.bf16.msra.mxu1 %v1500_v7 }
  0x1d   : > { %1419 = vmatprep.subr.bf16.mxu0 %v1501_v8  ;;  %1461 = vmatprep.subr.bf16.mxu1 %v1501_v8 }
  0x20   : > { %1420 = vmatpush3.bf16.msra.mxu0 %v1501_v8  ;;  %1469 = vmatpush3.bf16.msra.mxu1 %v1501_v8 }
  0x21   : > { %1421 = vmatprep.subr.bf16.mxu0 %v1502_v9  ;;  %1462 = vmatprep.subr.bf16.mxu1 %v1502_v9 }
  0x24   : > { %1422 = vmatpush3.bf16.msra.mxu0 %v1502_v9  ;;  %1470 = vmatpush3.bf16.msra.mxu1 %v1502_v9 }
  0x27   : > { %1424 = vmatmul.mubr.bf16.vlgmr.msra.gmra.mrb[0].mxu0 %v1505_v10  ;;  %1440 = vmatmul.mubr.bf16.vlgmr.msra.gmra.mrb[0].mxu1 %v1506_v11 }
  0x28   : > { %1427 = vmatprep.mubr.bf16.mxu0 %v1507_v12  ;;  %1443 = vmatprep.mubr.bf16.mxu1 %v1508_v13 }
  0x2f   : > { %1428 = vmatmul.mubr.bf16.gmra.mrb[4].mxu0 %v1509_v14  ;;  %1444 = vmatmul.mubr.bf16.gmra.mrb[4].mxu1 %v1510_v15 }
  0x30   : > { %1431 = vmatprep.mubr.bf16.mxu0 %v1511_v16  ;;  %1447 = vmatprep.mubr.bf16.mxu1 %v1512_v17 }
  0x37   : > { %1432 = vmatmul.mubr.bf16.gmra.mrb[8].mxu0 %v1513_v18  ;;  %1448 = vmatmul.mubr.bf16.gmra.mrb[8].mxu1 %v1514_v19 }
  0x38   : > { %1435 = vmatprep.mubr.bf16.mxu0 %v1515_v20  ;;  %1451 = vmatprep.mubr.bf16.mxu1 %v1516_v21 }
  0x3f   : > { %1436 = vmatmul.mubr.bf16.gmra.mrb[12].mxu0 %v1517_v22  ;;  %1452 = vmatmul.mubr.bf16.gmra.mrb[12].mxu1 %v1518_v23 }
  0xfa   : > { %v1425_v25 = vpop.f32.mrb[0].mxu0  ;;  %v1441_v26 = vpop.f32.mrb[0].mxu1 }
  0xfb   : > { %v789_v27 = vadd.f32 %v1425_v25, %v1634_v24  ;;  %v805_v28 = vadd.f32 %v1441_v26, %v1634_v24  ;;  %v554_v29 = vpop.f32.mrb[1].mxu0  ;;  %v618_v30 = vpop.f32.mrb[1].mxu1 }
  0xfc   : > { %v787_v31 = vadd.f32 %v1634_v24, %v554_v29  ;;  %v803_v32 = vadd.f32 %v1634_v24, %v618_v30  ;;  %v1426_v33 = vpop.f32.mrb[2].mxu0  ;;  %v1442_v34 = vpop.f32.mrb[2].mxu1 }
  0xfd   : > { %vm821_vm0 = vcmp.ge.f32.partialorder %v789_v27, 0.0  ;;  %v853_v35 = vmul.f32 0.2, %v789_v27  ;;  %vm837_vm1 = vcmp.ge.f32.partialorder %v805_v28, 0.0  ;;  %v869_v36 = vmul.f32 0.2, %v805_v28 }
  0xfe   : > { %vm819_vm2 = vcmp.ge.f32.partialorder %v787_v31, 0.0  ;;  %v851_v37 = vmul.f32 0.2, %v787_v31  ;;  %vm835_vm3 = vcmp.ge.f32.partialorder %v803_v32, 0.0  ;;  %v867_v38 = vmul.f32 0.2, %v803_v32 }
  0xff   : > { %v790_v39 = vadd.f32 %v1426_v33, %v1634_v24  ;;  %v806_v40 = vadd.f32 %v1442_v34, %v1634_v24  ;;  %v557_v41 = vpop.f32.mrb[3].mxu0  ;;  %v621_v42 = vpop.f32.mrb[3].mxu1  ;;  %v885_v43 = vsel %vm821_vm0, %v789_v27, %v853_v35  ;;  %v901_v44 = vsel %vm837_vm1, %v805_v28, %v869_v36 }
 0x100   : > { %v788_v45 = vadd.f32 %v1634_v24, %v557_v41  ;;  %v804_v46 = vadd.f32 %v1634_v24, %v621_v42  ;;  %v883_v51 = vsel %vm819_vm2, %v787_v31, %v851_v37  ;;  %v899_v52 = vsel %vm835_vm3, %v803_v32, %v867_v38 }
 0x101   : > { %vm822_vm4 = vcmp.ge.f32.partialorder %v790_v39, 0.0  ;;  %v854_v47 = vmul.f32 0.2, %v790_v39  ;;  %vm838_vm5 = vcmp.ge.f32.partialorder %v806_v40, 0.0  ;;  %v870_v48 = vmul.f32 0.2, %v806_v40 }
 0x102   : > { %vm820_vm6 = vcmp.ge.f32.partialorder %v788_v45, 0.0  ;;  %v852_v49 = vmul.f32 0.2, %v788_v45  ;;  %vm836_vm7 = vcmp.ge.f32.partialorder %v804_v46, 0.0  ;;  %v868_v50 = vmul.f32 0.2, %v804_v46 }
 0x103   : > { %v886_v53 = vsel %vm822_vm4, %v790_v39, %v854_v47  ;;  %v902_v54 = vsel %vm838_vm5, %v806_v40, %v870_v48  ;;  %v1429_v55 = vpop.f32.mrb[4].mxu0  ;;  %v1445_v56 = vpop.f32.mrb[4].mxu1 }
 0x104   : > { %v1296_v57 = vpack.c.bf16 %v886_v53, %v885_v43  ;;  %v1336_v58 = vpack.c.bf16 %v902_v54, %v901_v44  ;;  %v884_v59 = vsel %vm820_vm6, %v788_v45, %v852_v49  ;;  %v900_v60 = vsel %vm836_vm7, %v804_v46, %v868_v50  ;;  %v570_v61 = vpop.f32.mrb[5].mxu0  ;;  %v634_v62 = vpop.f32.mrb[5].mxu1 }
 0x105   : > { %v1291_v63 = vpack.c.bf16 %v884_v59, %v883_v51  ;;  %v1331_v0 = vpack.c.bf16 %v900_v60, %v899_v52  ;;  %v793_v1 = vadd.f32 %v1429_v55, %v1634_v24  ;;  %v809_v2 = vadd.f32 %v1445_v56, %v1634_v24  ;;  %v1430_v3 = vpop.f32.mrb[6].mxu0  ;;  %v1446_v4 = vpop.f32.mrb[6].mxu1 }
 0x106   : > { %1368 = vst [vmem:[%s1651_s17 + $0x8] sm:$0xff] %v1296_v57   ;;  %1376 = vst [vmem:[%s1651_s17 + $0x48] sm:$0xff] %v1336_v58   ;;  %v791_v5 = vadd.f32 %v1634_v24, %v570_v61  ;;  %v807_v6 = vadd.f32 %v1634_v24, %v634_v62  ;;  %v794_v7 = vadd.f32 %v1430_v3, %v1634_v24  ;;  %v573_v9 = vpop.f32.mrb[7].mxu0  ;;  %v637_v10 = vpop.f32.mrb[7].mxu1 }
 0x107   : > { %v810_v8 = vadd.f32 %v1446_v4, %v1634_v24  ;;  %1292 = vst [vmem:[%s1651_s17] sm:$0xff] %v1291_v63   ;;  %1375 = vst [vmem:[%s1651_s17 + $0x40] sm:$0xff] %v1331_v0   ;;  %vm825_vm8 = vcmp.ge.f32.partialorder %v793_v1, 0.0  ;;  %v857_v11 = vmul.f32 0.2, %v793_v1  ;;  %vm841_vm9 = vcmp.ge.f32.partialorder %v809_v2, 0.0 }
 0x108   : > { %v873_v12 = vmul.f32 0.2, %v809_v2  ;;  %vm823_vm10 = vcmp.ge.f32.partialorder %v791_v5, 0.0  ;;  %v855_v13 = vmul.f32 0.2, %v791_v5  ;;  %vm839_vm11 = vcmp.ge.f32.partialorder %v807_v6, 0.0 }
 0x109   : > { %v889_v14 = vsel %vm825_vm8, %v793_v1, %v857_v11  ;;  %v871_v15 = vmul.f32 0.2, %v807_v6  ;;  %vm826_vm12 = vcmp.ge.f32.partialorder %v794_v7, 0.0  ;;  %v858_v16 = vmul.f32 0.2, %v794_v7 }
 0x10a   : > { %v905_v17 = vsel %vm841_vm9, %v809_v2, %v873_v12  ;;  %v887_v18 = vsel %vm823_vm10, %v791_v5, %v855_v13  ;;  %vm842_vm13 = vcmp.ge.f32.partialorder %v810_v8, 0.0  ;;  %v874_v19 = vmul.f32 0.2, %v810_v8  ;;  %v1433_v20 = vpop.f32.mrb[8].mxu0  ;;  %v1449_v21 = vpop.f32.mrb[8].mxu1 }
 0x10b   : > { %v890_v22 = vsel %vm826_vm12, %v794_v7, %v858_v16  ;;  %v792_v23 = vadd.f32 %v1634_v24, %v573_v9  ;;  %v808_v25 = vadd.f32 %v1634_v24, %v637_v10  ;;  %v797_v26 = vadd.f32 %v1433_v20, %v1634_v24  ;;  %v586_v27 = vpop.f32.mrb[9].mxu0  ;;  %v650_v28 = vpop.f32.mrb[9].mxu1 }
 0x10c   : > { %v1306_v29 = vpack.c.bf16 %v890_v22, %v889_v14  ;;  %v906_v30 = vsel %vm842_vm13, %v810_v8, %v874_v19  ;;  %v813_v31 = vadd.f32 %v1449_v21, %v1634_v24  ;;  %v795_v32 = vadd.f32 %v1634_v24, %v586_v27  ;;  %v1434_v33 = vpop.f32.mrb[10].mxu0  ;;  %v1450_v34 = vpop.f32.mrb[10].mxu1 }
 0x10d   : > { %v1346_v35 = vpack.c.bf16 %v906_v30, %v905_v17  ;;  %vm824_vm14 = vcmp.ge.f32.partialorder %v792_v23, 0.0  ;;  %v856_v36 = vmul.f32 0.2, %v792_v23  ;;  %vm840_vm15 = vcmp.ge.f32.partialorder %v808_v25, 0.0  ;;  %v589_v37 = vpop.f32.mrb[11].mxu0  ;;  %v653_v38 = vpop.f32.mrb[11].mxu1 }
 0x10e   : > { %1370 = vst [vmem:[%s1651_s17 + $0x18] sm:$0xff] %v1306_v29   ;;  %v872_v39 = vmul.f32 0.2, %v808_v25  ;;  %vm829_vm0 = vcmp.ge.f32.partialorder %v797_v26, 0.0  ;;  %v861_v40 = vmul.f32 0.2, %v797_v26  ;;  %v903_v41 = vsel %vm839_vm11, %v807_v6, %v871_v15 }
 0x10f   : > { %vm845_vm1 = vcmp.ge.f32.partialorder %v813_v31, 0.0  ;;  %1378 = vst [vmem:[%s1651_s17 + $0x58] sm:$0xff] %v1346_v35   ;;  %v888_v42 = vsel %vm824_vm14, %v792_v23, %v856_v36  ;;  %v877_v43 = vmul.f32 0.2, %v813_v31  ;;  %vm827_vm2 = vcmp.ge.f32.partialorder %v795_v32, 0.0 }
 0x110   : > { %v1301_v44 = vpack.c.bf16 %v888_v42, %v887_v18  ;;  %v904_v45 = vsel %vm840_vm15, %v808_v25, %v872_v39  ;;  %v859_v46 = vmul.f32 0.2, %v795_v32  ;;  %v811_v47 = vadd.f32 %v1634_v24, %v650_v28 }
 0x111   : > { %v1341_v48 = vpack.c.bf16 %v904_v45, %v903_v41  ;;  %v893_v49 = vsel %vm829_vm0, %v797_v26, %v861_v40  ;;  %v909_v50 = vsel %vm845_vm1, %v813_v31, %v877_v43  ;;  %v798_v51 = vadd.f32 %v1434_v33, %v1634_v24 }
 0x112   : > { %1369 = vst [vmem:[%s1651_s17 + $0x10] sm:$0xff] %v1301_v44   ;;  %vm843_vm3 = vcmp.ge.f32.partialorder %v811_v47, 0.0  ;;  %v875_v52 = vmul.f32 0.2, %v811_v47  ;;  %v814_v53 = vadd.f32 %v1450_v34, %v1634_v24  ;;  %v796_v54 = vadd.f32 %v1634_v24, %v589_v37  ;;  %v1437_v55 = vpop.f32.mrb[12].mxu0  ;;  %v1453_v56 = vpop.f32.mrb[12].mxu1 }
 0x113   : > { %1377 = vst [vmem:[%s1651_s17 + $0x50] sm:$0xff] %v1341_v48   ;;  %vm830_vm4 = vcmp.ge.f32.partialorder %v798_v51, 0.0  ;;  %v862_v57 = vmul.f32 0.2, %v798_v51  ;;  %v812_v58 = vadd.f32 %v1634_v24, %v653_v38  ;;  %v801_v59 = vadd.f32 %v1437_v55, %v1634_v24  ;;  %v602_v60 = vpop.f32.mrb[13].mxu0  ;;  %v666_v61 = vpop.f32.mrb[13].mxu1 }
 0x114   : > { %v891_v62 = vsel %vm827_vm2, %v795_v32, %v859_v46  ;;  %vm846_vm5 = vcmp.ge.f32.partialorder %v814_v53, 0.0  ;;  %v878_v63 = vmul.f32 0.2, %v814_v53  ;;  %vm828_vm6 = vcmp.ge.f32.partialorder %v796_v54, 0.0  ;;  %v1438_v0 = vpop.f32.mrb[14].mxu0  ;;  %v1454_v1 = vpop.f32.mrb[14].mxu1 }
 0x115   : > { %v894_v2 = vsel %vm830_vm4, %v798_v51, %v862_v57  ;;  %v860_v3 = vmul.f32 0.2, %v796_v54  ;;  %vm844_vm7 = vcmp.ge.f32.partialorder %v812_v58, 0.0  ;;  %v876_v4 = vmul.f32 0.2, %v812_v58  ;;  %v605_v5 = vpop.f32.mrb[15].mxu0 }
 0x116   : > { %v907_v6 = vsel %vm843_vm3, %v811_v47, %v875_v52  ;;  %v1316_v7 = vpack.c.bf16 %v894_v2, %v893_v49  ;;  %v910_v8 = vsel %vm846_vm5, %v814_v53, %v878_v63  ;;  %v865_v9 = vmul.f32 0.2, %v801_v59  ;;  %v669_v10 = vpop.f32.mrb[15].mxu1 }
 0x117   : > { %v1356_v11 = vpack.c.bf16 %v910_v8, %v909_v50  ;;  %v892_v12 = vsel %vm828_vm6, %v796_v54, %v860_v3  ;;  %v908_v13 = vsel %vm844_vm7, %v812_v58, %v876_v4  ;;  %v817_v14 = vadd.f32 %v1453_v56, %v1634_v24 }
 0x118   : > { %1372 = vst [vmem:[%s1651_s17 + $0x28] sm:$0xff] %v1316_v7   ;;  %v1311_v15 = vpack.c.bf16 %v892_v12, %v891_v62  ;;  %v1351_v16 = vpack.c.bf16 %v908_v13, %v907_v6  ;;  %vm833_vm8 = vcmp.ge.f32.partialorder %v801_v59, 0.0  ;;  %v799_v17 = vadd.f32 %v1634_v24, %v602_v60 }
 0x119   : > { %1380 = vst [vmem:[%s1651_s17 + $0x68] sm:$0xff] %v1356_v11   ;;  %vm849_vm9 = vcmp.ge.f32.partialorder %v817_v14, 0.0  ;;  %v881_v18 = vmul.f32 0.2, %v817_v14  ;;  %v815_v19 = vadd.f32 %v1634_v24, %v666_v61  ;;  %v802_v20 = vadd.f32 %v1438_v0, %v1634_v24 }
 0x11a   : > { %1371 = vst [vmem:[%s1651_s17 + $0x20] sm:$0xff] %v1311_v15   ;;  %1379 = vst [vmem:[%s1651_s17 + $0x60] sm:$0xff] %v1351_v16   ;;  %v863_v21 = vmul.f32 0.2, %v799_v17  ;;  %v818_v22 = vadd.f32 %v1454_v1, %v1634_v24  ;;  %v800_v23 = vadd.f32 %v1634_v24, %v605_v5  ;;  %v897_v25 = vsel %vm833_vm8, %v801_v59, %v865_v9 }
 0x11b   : > { %vm831_vm10 = vcmp.ge.f32.partialorder %v799_v17, 0.0  ;;  %vm834_vm11 = vcmp.ge.f32.partialorder %v802_v20, 0.0  ;;  %v913_v26 = vsel %vm849_vm9, %v817_v14, %v881_v18  ;;  %v866_v27 = vmul.f32 0.2, %v802_v20 }
 0x11c   : > { %vm850_vm12 = vcmp.ge.f32.partialorder %v818_v22, 0.0  ;;  %v882_v28 = vmul.f32 0.2, %v818_v22  ;;  %vm847_vm13 = vcmp.ge.f32.partialorder %v815_v19, 0.0  ;;  %vm832_vm14 = vcmp.ge.f32.partialorder %v800_v23, 0.0 }
 0x11d   : > { %v864_v29 = vmul.f32 0.2, %v800_v23  ;;  %v816_v30 = vadd.f32 %v1634_v24, %v669_v10  ;;  %v895_v31 = vsel %vm831_vm10, %v799_v17, %v863_v21  ;;  %v879_v32 = vmul.f32 0.2, %v815_v19 }
 0x11e   : > { %v898_v33 = vsel %vm834_vm11, %v802_v20, %v866_v27  ;;  %v914_v34 = vsel %vm850_vm12, %v818_v22, %v882_v28 }
 0x11f   : > { %v1326_v35 = vpack.c.bf16 %v898_v33, %v897_v25  ;;  %v1366_v36 = vpack.c.bf16 %v914_v34, %v913_v26  ;;  %v896_v37 = vsel %vm832_vm14, %v800_v23, %v864_v29  ;;  %vm848_vm15 = vcmp.ge.f32.partialorder %v816_v30, 0.0 }
 0x120   : > { %v1321_v38 = vpack.c.bf16 %v896_v37, %v895_v31  ;;  %v880_v39 = vmul.f32 0.2, %v816_v30  ;;  %v911_v40 = vsel %vm847_vm13, %v815_v19, %v879_v32 }
 0x121   : > { %1374 = vst [vmem:[%s1651_s17 + $0x38] sm:$0xff] %v1326_v35   ;;  %1382 = vst [vmem:[%s1651_s17 + $0x78] sm:$0xff] %v1366_v36  }
 0x122   : > { %1373 = vst [vmem:[%s1651_s17 + $0x30] sm:$0xff] %v1321_v38   ;;  %v912_v41 = vsel %vm848_vm15, %v816_v30, %v880_v39 }
 0x123   : > { %v1361_v42 = vpack.c.bf16 %v912_v41, %v911_v40 }
 0x125   : > { %1381 = vst [vmem:[%s1651_s17 + $0x70] sm:$0xff] %v1361_v42  }
 0x126 PF: > { %s13_s14 = sadd.s32 1, %s1541_s14   ;;  %s1710_s12 = smov %s1537_s13 }
 0x127   : > { %p10_p5 = scmp.ge.s32.totalorder %s13_s14, 4   ;;  %s1711_s13 = smov %s1713_s15 }
 0x129   :  { %12 = sbr.rel (!%p10_p5) target bundleno = 2 (0x2), region = 76 }

// kernel: discriminator_forward.5
= control target key start
LH: loop header
LB: loop body
LE: loop exit
PB: predicated region body
PF: predicated region fallthrough
CT: control target
= control target key end

     0   :  { %s775_s1 = inlined_call_operand.vmem [shape: bf16[128,128], index: 1, kind: input, shape index: {}]   ;;  %s776_s0 = inlined_call_operand.vmem [shape: bf16[128,128], index: 0, kind: input, shape index: {}]   ;;  %s777_s2 = inlined_call_operand.vmem [shape: f32[1,128], index: 2, kind: input, shape index: {}]   ;;  %s778_s3 = inlined_call_operand.vmem [shape: bf16[128,128], index: 3, kind: output, shape index: {}]  }
   0x1   :  { %v642_v0 = vld [vmem:[%s775_s1] sm:$0xff]   ;;  %v643_v1 = vld [vmem:[%s775_s1 + $0x8] sm:$0xff]   ;;  %v644_v2 = vld [vmem:[%s775_s1 + $0x10] sm:$0xff]  }
   0x2   :  { %594 = vmatprep.subr.bf16.mxu0 %v642_v0  ;;  %626 = vmatprep.subr.bf16.mxu1 %v642_v0  ;;  %v645_v3 = vld [vmem:[%s775_s1 + $0x18] sm:$0xff]   ;;  %v650_v4 = vld [vmem:[%s776_s0] sm:$0xff]   ;;  %v647_v7 = vld [vmem:[%s775_s1 + $0x28] sm:$0xff]  }
   0x3   :  { %595 = vmatpush3.bf16.msra.mxu0 %v642_v0  ;;  %634 = vmatpush3.bf16.msra.mxu1 %v642_v0  ;;  %v651_v5 = vld [vmem:[%s776_s0 + $0x20] sm:$0xff]   ;;  %v648_v8 = vld [vmem:[%s775_s1 + $0x30] sm:$0xff]   ;;  %v649_v9 = vld [vmem:[%s775_s1 + $0x38] sm:$0xff]  }
   0x4   :  { %596 = vmatprep.subr.bf16.mxu0 %v643_v1  ;;  %627 = vmatprep.subr.bf16.mxu1 %v643_v1  ;;  %v646_v6 = vld [vmem:[%s775_s1 + $0x20] sm:$0xff]   ;;  %v652_v10 = vld [vmem:[%s776_s0 + $0x8] sm:$0xff]   ;;  %v654_v12 = vld [vmem:[%s776_s0 + $0x10] sm:$0xff]  }
   0x5   :  { %610 = vmatprep.mubr.bf16.mxu0 %v650_v4  ;;  %618 = vmatprep.mubr.bf16.mxu1 %v651_v5  ;;  %v653_v11 = vld [vmem:[%s776_s0 + $0x28] sm:$0xff]   ;;  %v655_v13 = vld [vmem:[%s776_s0 + $0x30] sm:$0xff]   ;;  %v656_v14 = vld [vmem:[%s776_s0 + $0x18] sm:$0xff]  }
   0x6   :  { %v657_v15 = vld [vmem:[%s776_s0 + $0x38] sm:$0xff]   ;;  %v729_v16 = vld [vmem:[%s777_s2] ss:$0 sm:$0xff] }
   0x7   :  { %597 = vmatpush3.bf16.msra.mxu0 %v643_v1  ;;  %635 = vmatpush3.bf16.msra.mxu1 %v643_v1 }
   0x8   :  { %598 = vmatprep.subr.bf16.mxu0 %v644_v2  ;;  %628 = vmatprep.subr.bf16.mxu1 %v644_v2 }
   0xb   :  { %599 = vmatpush3.bf16.msra.mxu0 %v644_v2  ;;  %636 = vmatpush3.bf16.msra.mxu1 %v644_v2 }
   0xc   :  { %600 = vmatprep.subr.bf16.mxu0 %v645_v3  ;;  %629 = vmatprep.subr.bf16.mxu1 %v645_v3 }
   0xf   :  { %601 = vmatpush3.bf16.msra.mxu0 %v645_v3  ;;  %637 = vmatpush3.bf16.msra.mxu1 %v645_v3 }
  0x10   :  { %602 = vmatprep.subr.bf16.mxu0 %v646_v6  ;;  %630 = vmatprep.subr.bf16.mxu1 %v646_v6 }
  0x13   :  { %603 = vmatpush3.bf16.msra.mxu0 %v646_v6  ;;  %638 = vmatpush3.bf16.msra.mxu1 %v646_v6 }
  0x14   :  { %604 = vmatprep.subr.bf16.mxu0 %v647_v7  ;;  %631 = vmatprep.subr.bf16.mxu1 %v647_v7 }
  0x17   :  { %605 = vmatpush3.bf16.msra.mxu0 %v647_v7  ;;  %639 = vmatpush3.bf16.msra.mxu1 %v647_v7 }
  0x18   :  { %606 = vmatprep.subr.bf16.mxu0 %v648_v8  ;;  %632 = vmatprep.subr.bf16.mxu1 %v648_v8 }
  0x1b   :  { %607 = vmatpush3.bf16.msra.mxu0 %v648_v8  ;;  %640 = vmatpush3.bf16.msra.mxu1 %v648_v8 }
  0x1c   :  { %608 = vmatprep.subr.bf16.mxu0 %v649_v9  ;;  %633 = vmatprep.subr.bf16.mxu1 %v649_v9 }
  0x1f   :  { %609 = vmatpush3.bf16.msra.mxu0 %v649_v9  ;;  %641 = vmatpush3.bf16.msra.mxu1 %v649_v9 }
  0x22   :  { %611 = vmatmul.mubr.bf16.vlgmr.msra.gmra.mrb[0].mxu0 %v652_v10  ;;  %619 = vmatmul.mubr.bf16.vlgmr.msra.gmra.mrb[0].mxu1 %v653_v11 }
  0x23   :  { %614 = vmatprep.mubr.bf16.mxu0 %v654_v12  ;;  %622 = vmatprep.mubr.bf16.mxu1 %v655_v13 }
  0x2a   :  { %615 = vmatmul.mubr.bf16.gmra.mrb[4].mxu0 %v656_v14  ;;  %623 = vmatmul.mubr.bf16.gmra.mrb[4].mxu1 %v657_v15 }
  0xf5   :  { %v612_v17 = vpop.f32.mrb[0].mxu0  ;;  %v620_v18 = vpop.f32.mrb[0].mxu1 }
  0xf6   :  { %v336_v19 = vadd.f32 %v612_v17, %v729_v16  ;;  %v344_v20 = vadd.f32 %v620_v18, %v729_v16  ;;  %v213_v21 = vpop.f32.mrb[1].mxu0  ;;  %v245_v22 = vpop.f32.mrb[1].mxu1 }
  0xf7   :  { %v334_v23 = vadd.f32 %v729_v16, %v213_v21  ;;  %v342_v24 = vadd.f32 %v729_v16, %v245_v22  ;;  %v613_v25 = vpop.f32.mrb[2].mxu0  ;;  %v621_v26 = vpop.f32.mrb[2].mxu1 }
  0xf8   :  { %vm352_vm0 = vcmp.ge.f32.partialorder %v336_v19, 0.0  ;;  %v368_v27 = vmul.f32 0.2, %v336_v19  ;;  %vm360_vm1 = vcmp.ge.f32.partialorder %v344_v20, 0.0  ;;  %v376_v28 = vmul.f32 0.2, %v344_v20 }
  0xf9   :  { %vm350_vm2 = vcmp.ge.f32.partialorder %v334_v23, 0.0  ;;  %v366_v29 = vmul.f32 0.2, %v334_v23  ;;  %vm358_vm3 = vcmp.ge.f32.partialorder %v342_v24, 0.0  ;;  %v374_v30 = vmul.f32 0.2, %v342_v24 }
  0xfa   :  { %v337_v31 = vadd.f32 %v613_v25, %v729_v16  ;;  %v345_v32 = vadd.f32 %v621_v26, %v729_v16  ;;  %v216_v33 = vpop.f32.mrb[3].mxu0  ;;  %v248_v34 = vpop.f32.mrb[3].mxu1  ;;  %v384_v35 = vsel %vm352_vm0, %v336_v19, %v368_v27  ;;  %v392_v36 = vsel %vm360_vm1, %v344_v20, %v376_v28 }
  0xfb   :  { %v335_v37 = vadd.f32 %v729_v16, %v216_v33  ;;  %v343_v38 = vadd.f32 %v729_v16, %v248_v34  ;;  %v382_v43 = vsel %vm350_vm2, %v334_v23, %v366_v29  ;;  %v390_v44 = vsel %vm358_vm3, %v342_v24, %v374_v30 }
  0xfc   :  { %vm353_vm4 = vcmp.ge.f32.partialorder %v337_v31, 0.0  ;;  %v369_v39 = vmul.f32 0.2, %v337_v31  ;;  %vm361_vm5 = vcmp.ge.f32.partialorder %v345_v32, 0.0  ;;  %v377_v40 = vmul.f32 0.2, %v345_v32 }
  0xfd   :  { %vm351_vm6 = vcmp.ge.f32.partialorder %v335_v37, 0.0  ;;  %v367_v41 = vmul.f32 0.2, %v335_v37  ;;  %vm359_vm7 = vcmp.ge.f32.partialorder %v343_v38, 0.0  ;;  %v375_v42 = vmul.f32 0.2, %v343_v38 }
  0xfe   :  { %v385_v45 = vsel %vm353_vm4, %v337_v31, %v369_v39  ;;  %v393_v46 = vsel %vm361_vm5, %v345_v32, %v377_v40  ;;  %v616_v47 = vpop.f32.mrb[4].mxu0  ;;  %v624_v48 = vpop.f32.mrb[4].mxu1 }
  0xff   :  { %v539_v49 = vpack.c.bf16 %v385_v45, %v384_v35  ;;  %v559_v50 = vpack.c.bf16 %v393_v46, %v392_v36  ;;  %v383_v51 = vsel %vm351_vm6, %v335_v37, %v367_v41  ;;  %v391_v52 = vsel %vm359_vm7, %v343_v38, %v375_v42  ;;  %v229_v53 = vpop.f32.mrb[5].mxu0  ;;  %v261_v54 = vpop.f32.mrb[5].mxu1 }
 0x100   :  { %v534_v55 = vpack.c.bf16 %v383_v51, %v382_v43  ;;  %v554_v56 = vpack.c.bf16 %v391_v52, %v390_v44  ;;  %v340_v57 = vadd.f32 %v616_v47, %v729_v16  ;;  %v348_v58 = vadd.f32 %v624_v48, %v729_v16  ;;  %v617_v59 = vpop.f32.mrb[6].mxu0  ;;  %v625_v60 = vpop.f32.mrb[6].mxu1 }
 0x101   :  { %571 = vst [vmem:[%s778_s3 + $0x8] sm:$0xff] %v539_v49   ;;  %575 = vst [vmem:[%s778_s3 + $0x28] sm:$0xff] %v559_v50   ;;  %v338_v61 = vadd.f32 %v729_v16, %v229_v53  ;;  %v346_v62 = vadd.f32 %v729_v16, %v261_v54  ;;  %v341_v63 = vadd.f32 %v617_v59, %v729_v16  ;;  %v232_v1 = vpop.f32.mrb[7].mxu0  ;;  %v264_v2 = vpop.f32.mrb[7].mxu1 }
 0x102   :  { %v349_v0 = vadd.f32 %v625_v60, %v729_v16  ;;  %535 = vst [vmem:[%s778_s3] sm:$0xff] %v534_v55   ;;  %574 = vst [vmem:[%s778_s3 + $0x20] sm:$0xff] %v554_v56   ;;  %v372_v3 = vmul.f32 0.2, %v340_v57  ;;  %vm356_vm8 = vcmp.ge.f32.partialorder %v340_v57, 0.0  ;;  %v380_v4 = vmul.f32 0.2, %v348_v58 }
 0x103   :  { %vm364_vm9 = vcmp.ge.f32.partialorder %v348_v58, 0.0  ;;  %vm354_vm10 = vcmp.ge.f32.partialorder %v338_v61, 0.0  ;;  %vm357_vm11 = vcmp.ge.f32.partialorder %v341_v63, 0.0  ;;  %v373_v5 = vmul.f32 0.2, %v341_v63 }
 0x104   :  { %v370_v6 = vmul.f32 0.2, %v338_v61  ;;  %vm362_vm12 = vcmp.ge.f32.partialorder %v346_v62, 0.0  ;;  %vm365_vm13 = vcmp.ge.f32.partialorder %v349_v0, 0.0  ;;  %v381_v7 = vmul.f32 0.2, %v349_v0 }
 0x105   :  { %v388_v8 = vsel %vm356_vm8, %v340_v57, %v372_v3  ;;  %v389_v9 = vsel %vm357_vm11, %v341_v63, %v373_v5  ;;  %v339_v10 = vadd.f32 %v729_v16, %v232_v1  ;;  %v347_v11 = vadd.f32 %v729_v16, %v264_v2 }
 0x106   :  { %v396_v12 = vsel %vm364_vm9, %v348_v58, %v380_v4  ;;  %v378_v13 = vmul.f32 0.2, %v346_v62  ;;  %v549_v14 = vpack.c.bf16 %v389_v9, %v388_v8  ;;  %v397_v15 = vsel %vm365_vm13, %v349_v0, %v381_v7 }
 0x107   :  { %v569_v17 = vpack.c.bf16 %v397_v15, %v396_v12  ;;  %vm355_vm14 = vcmp.ge.f32.partialorder %v339_v10, 0.0  ;;  %v371_v18 = vmul.f32 0.2, %v339_v10  ;;  %vm363_vm15 = vcmp.ge.f32.partialorder %v347_v11, 0.0 }
 0x108   :  { %573 = vst [vmem:[%s778_s3 + $0x18] sm:$0xff] %v549_v14   ;;  %v379_v19 = vmul.f32 0.2, %v347_v11  ;;  %v386_v20 = vsel %vm354_vm10, %v338_v61, %v370_v6  ;;  %v394_v21 = vsel %vm362_vm12, %v346_v62, %v378_v13 }
 0x109   :  { %577 = vst [vmem:[%s778_s3 + $0x38] sm:$0xff] %v569_v17   ;;  %v387_v16 = vsel %vm355_vm14, %v339_v10, %v371_v18 }
 0x10a   :  { %v544_v22 = vpack.c.bf16 %v387_v16, %v386_v20  ;;  %v395_v23 = vsel %vm363_vm15, %v347_v11, %v379_v19 }
 0x10b   :  { %v564_v24 = vpack.c.bf16 %v395_v23, %v394_v21 }
 0x10c   :  { %572 = vst [vmem:[%s778_s3 + $0x10] sm:$0xff] %v544_v22  }
 0x10d   :  { %576 = vst [vmem:[%s778_s3 + $0x30] sm:$0xff] %v564_v24  }

// kernel: discriminator_forward.6
= control target key start
LH: loop header
LB: loop body
LE: loop exit
PB: predicated region body
PF: predicated region fallthrough
CT: control target
= control target key end

     0   :  { %s485_s1 = inlined_call_operand.vmem [shape: bf16[256,128], index: 1, kind: input, shape index: {}]   ;;  %s486_s0 = inlined_call_operand.vmem [shape: bf16[32,256], index: 0, kind: input, shape index: {}]   ;;  %s487_s2 = inlined_call_operand.vmem [shape: f32[1,128], index: 2, kind: input, shape index: {}]   ;;  %s488_s3 = inlined_call_operand.vmem [shape: bf16[32,128], index: 3, kind: output, shape index: {}]  }
   0x1   :  { %v374_v0 = vld [vmem:[%s485_s1 + $0x40] sm:$0xff]   ;;  %v376_v2 = vld [vmem:[%s485_s1 + $0x48] sm:$0xff]   ;;  %v378_v4 = vld [vmem:[%s485_s1 + $0x50] sm:$0xff]  }
   0x2   :  { %v375_v1 = vld [vmem:[%s485_s1] sm:$0xff]   ;;  %330 = vmatprep.subr.bf16.mxu0 %v374_v0  ;;  %358 = vmatprep.subr.bf16.mxu1 %v374_v0  ;;  %v377_v3 = vld [vmem:[%s485_s1 + $0x8] sm:$0xff]   ;;  %v379_v5 = vld [vmem:[%s485_s1 + $0x10] sm:$0xff]  }
   0x3   :  { %331 = vmatpush3.bf16.msra.mxu0 %v375_v1  ;;  %366 = vmatpush3.bf16.msra.mxu1 %v375_v1  ;;  %v380_v6 = vld [vmem:[%s485_s1 + $0x58] sm:$0xff]   ;;  %v382_v8 = vld [vmem:[%s485_s1 + $0x60] sm:$0xff]   ;;  %v384_v10 = vld [vmem:[%s485_s1 + $0x68] sm:$0xff]  }
   0x4   :  { %332 = vmatprep.subr.bf16.mxu0 %v376_v2  ;;  %359 = vmatprep.subr.bf16.mxu1 %v376_v2  ;;  %v381_v7 = vld [vmem:[%s485_s1 + $0x18] sm:$0xff]   ;;  %v383_v9 = vld [vmem:[%s485_s1 + $0x20] sm:$0xff]   ;;  %v385_v13 = vld [vmem:[%s485_s1 + $0x28] sm:$0xff]  }
   0x5   :  { %v392_v11 = vld [vmem:[%s486_s0 + $0x4] ss:$8 sps:$4 sm:$0xff]   ;;  %v395_v12 = vld [vmem:[%s486_s0 + $0x14] ss:$8 sps:$4 sm:$0xff]   ;;  %v390_v18 = vld [vmem:[%s486_s0] ss:$8 sps:$4 sm:$0xff]  }
   0x6   :  { %v386_v14 = vld [vmem:[%s485_s1 + $0x70] sm:$0xff]   ;;  %211 = vmatprep.mubr.bf16.mxu0 %v392_v11  ;;  %219 = vmatprep.mubr.bf16.mxu1 %v395_v12  ;;  %v388_v16 = vld [vmem:[%s485_s1 + $0x78] sm:$0xff]   ;;  %v310_v23 = vld [vmem:[%s487_s2] ss:$0 sm:$0xff] }
   0x7   :  { %333 = vmatpush3.bf16.msra.mxu0 %v377_v3  ;;  %367 = vmatpush3.bf16.msra.mxu1 %v377_v3  ;;  %v387_v15 = vld [vmem:[%s485_s1 + $0x30] sm:$0xff]   ;;  %v389_v17 = vld [vmem:[%s485_s1 + $0x38] sm:$0xff]  }
   0x8   :  { %334 = vmatprep.subr.bf16.mxu0 %v378_v4  ;;  %360 = vmatprep.subr.bf16.mxu1 %v378_v4  ;;  %v393_v19 = vld [vmem:[%s486_s0 + $0x10] ss:$8 sps:$4 sm:$0xff]  }
   0xb   :  { %335 = vmatpush3.bf16.msra.mxu0 %v379_v5  ;;  %368 = vmatpush3.bf16.msra.mxu1 %v379_v5 }
   0xc   :  { %336 = vmatprep.subr.bf16.mxu0 %v380_v6  ;;  %361 = vmatprep.subr.bf16.mxu1 %v380_v6 }
   0xf   :  { %337 = vmatpush3.bf16.msra.mxu0 %v381_v7  ;;  %369 = vmatpush3.bf16.msra.mxu1 %v381_v7 }
  0x10   :  { %338 = vmatprep.subr.bf16.mxu0 %v382_v8  ;;  %362 = vmatprep.subr.bf16.mxu1 %v382_v8 }
  0x13   :  { %339 = vmatpush3.bf16.msra.mxu0 %v383_v9  ;;  %370 = vmatpush3.bf16.msra.mxu1 %v383_v9 }
  0x14   :  { %340 = vmatprep.subr.bf16.mxu0 %v384_v10  ;;  %363 = vmatprep.subr.bf16.mxu1 %v384_v10 }
  0x17   :  { %341 = vmatpush3.bf16.msra.mxu0 %v385_v13  ;;  %371 = vmatpush3.bf16.msra.mxu1 %v385_v13 }
  0x18   :  { %342 = vmatprep.subr.bf16.mxu0 %v386_v14  ;;  %364 = vmatprep.subr.bf16.mxu1 %v386_v14 }
  0x1b   :  { %343 = vmatpush3.bf16.msra.mxu0 %v387_v15  ;;  %372 = vmatpush3.bf16.msra.mxu1 %v387_v15 }
  0x1c   :  { %344 = vmatprep.subr.bf16.mxu0 %v388_v16  ;;  %365 = vmatprep.subr.bf16.mxu1 %v388_v16 }
  0x1f   :  { %345 = vmatpush3.bf16.msra.mxu0 %v389_v17  ;;  %373 = vmatpush3.bf16.msra.mxu1 %v389_v17 }
  0x22   :  { %212 = vmatmul.mubr.bf16.vlgmr.msra.gmra.mrb[0].mxu0 %v390_v18  ;;  %220 = vmatmul.mubr.bf16.vlgmr.msra.gmra.mrb[0].mxu1 %v393_v19 }
  0xf5   :  { %v346_v20 = vpop.f32.mrb[0].mxu0  ;;  %v352_v21 = vpop.f32.mrb[0].mxu1 }
  0xf6   :  { %v347_v22 = vpop.f32.mrb[1].mxu0  ;;  %v353_v24 = vpop.f32.mrb[1].mxu1 }
  0xf7   :  { %v348_v25 = vadd.f32 %v347_v22, %v346_v20  ;;  %v354_v26 = vadd.f32 %v353_v24, %v352_v21  ;;  %v349_v27 = vpop.f32.mrb[2].mxu0  ;;  %v355_v28 = vpop.f32.mrb[2].mxu1 }
  0xf8   :  { %v350_v29 = vpop.f32.mrb[3].mxu0  ;;  %v356_v30 = vpop.f32.mrb[3].mxu1 }
  0xf9   :  { %v250_v31 = vadd.f32 %v348_v25, %v310_v23  ;;  %v252_v32 = vadd.f32 %v354_v26, %v310_v23  ;;  %v351_v33 = vadd.f32 %v350_v29, %v349_v27  ;;  %v357_v34 = vadd.f32 %v356_v30, %v355_v28 }
  0xfb   :  { %v258_v35 = vmul.f32 0.2, %v250_v31  ;;  %v260_v36 = vmul.f32 0.2, %v252_v32  ;;  %v251_v37 = vadd.f32 %v351_v33, %v310_v23  ;;  %v253_v38 = vadd.f32 %v357_v34, %v310_v23 }
  0xfc   :  { %vm254_vm0 = vcmp.ge.f32.partialorder %v250_v31, 0.0  ;;  %vm256_vm1 = vcmp.ge.f32.partialorder %v252_v32, 0.0 }
  0xfd   :  { %vm255_vm2 = vcmp.ge.f32.partialorder %v251_v37, 0.0  ;;  %v259_v39 = vmul.f32 0.2, %v251_v37  ;;  %vm257_vm3 = vcmp.ge.f32.partialorder %v253_v38, 0.0  ;;  %v261_v40 = vmul.f32 0.2, %v253_v38 }
  0xfe   :  { %v262_v41 = vsel %vm254_vm0, %v250_v31, %v258_v35  ;;  %v264_v42 = vsel %vm256_vm1, %v252_v32, %v260_v36 }
  0xff   :  { %v263_v43 = vsel %vm255_vm2, %v251_v37, %v259_v39  ;;  %v265_v44 = vsel %vm257_vm3, %v253_v38, %v261_v40 }
 0x100   :  { %v322_v45 = vpack.c.bf16 %v263_v43, %v262_v41  ;;  %v327_v46 = vpack.c.bf16 %v265_v44, %v264_v42 }
 0x102   :  { %323 = vst [vmem:[%s488_s3] sm:$0xff] %v322_v45   ;;  %329 = vst [vmem:[%s488_s3 + $0x8] sm:$0xff] %v327_v46  }

// kernel: discriminator_forward.7
= control target key start
LH: loop header
LB: loop body
LE: loop exit
PB: predicated region body
PF: predicated region fallthrough
CT: control target
= control target key end

     0   :  { %s637_s1 = inlined_call_operand.vmem [shape: bf16[512,128], index: 1, kind: input, shape index: {}]   ;;  %s638_s0 = inlined_call_operand.vmem [shape: bf16[8,512], index: 0, kind: input, shape index: {}]   ;;  %s639_s2 = inlined_call_operand.vmem [shape: f32[1,128], index: 2, kind: input, shape index: {}]   ;;  %s640_s3 = inlined_call_operand.vmem [shape: f32[8,128], index: 3, kind: output, shape index: {}]  }
   0x1   :  { %v473_v0 = vld [vmem:[%s637_s1 + $0x40] sm:$0xff]   ;;  %v477_v4 = vld [vmem:[%s637_s1 + $0x48] sm:$0xff]   ;;  %v481_v8 = vld [vmem:[%s637_s1 + $0x50] sm:$0xff]  }
   0x2   :  { %v474_v1 = vld [vmem:[%s637_s1 + $0xc0] sm:$0xff]   ;;  %429 = vmatprep.subr.bf16.mxu0 %v473_v0  ;;  %v478_v5 = vld [vmem:[%s637_s1 + $0xc8] sm:$0xff]   ;;  %v482_v9 = vld [vmem:[%s637_s1 + $0xd0] sm:$0xff]  }
   0x3   :  { %v475_v2 = vld [vmem:[%s637_s1] sm:$0xff]   ;;  %451 = vmatprep.subr.bf16.mxu1 %v474_v1  ;;  %v479_v6 = vld [vmem:[%s637_s1 + $0x8] sm:$0xff]   ;;  %v483_v10 = vld [vmem:[%s637_s1 + $0x10] sm:$0xff]  }
   0x4   :  { %v476_v3 = vld [vmem:[%s637_s1 + $0x80] sm:$0xff]   ;;  %430 = vmatpush3.bf16.msra.mxu0 %v475_v2  ;;  %v480_v7 = vld [vmem:[%s637_s1 + $0x88] sm:$0xff]   ;;  %v484_v11 = vld [vmem:[%s637_s1 + $0x90] sm:$0xff]  }
   0x5   :  { %452 = vmatpush3.bf16.msra.mxu1 %v476_v3  ;;  %431 = vmatprep.subr.bf16.mxu0 %v477_v4  ;;  %v485_v12 = vld [vmem:[%s637_s1 + $0x58] sm:$0xff]   ;;  %v489_v16 = vld [vmem:[%s637_s1 + $0x60] sm:$0xff]   ;;  %v493_v20 = vld [vmem:[%s637_s1 + $0x68] sm:$0xff]  }
   0x6   :  { %453 = vmatprep.subr.bf16.mxu1 %v478_v5  ;;  %v486_v13 = vld [vmem:[%s637_s1 + $0xd8] sm:$0xff]   ;;  %v490_v17 = vld [vmem:[%s637_s1 + $0xe0] sm:$0xff]   ;;  %v494_v21 = vld [vmem:[%s637_s1 + $0xe8] sm:$0xff]  }
   0x7   :  { %v487_v14 = vld [vmem:[%s637_s1 + $0x18] sm:$0xff]   ;;  %v491_v18 = vld [vmem:[%s637_s1 + $0x20] sm:$0xff]   ;;  %v495_v22 = vld [vmem:[%s637_s1 + $0x28] sm:$0xff]  }
   0x8   :  { %432 = vmatpush3.bf16.msra.mxu0 %v479_v6  ;;  %v488_v15 = vld [vmem:[%s637_s1 + $0x98] sm:$0xff]   ;;  %v492_v19 = vld [vmem:[%s637_s1 + $0xa0] sm:$0xff]   ;;  %v496_v23 = vld [vmem:[%s637_s1 + $0xa8] sm:$0xff]  }
   0x9   :  { %454 = vmatpush3.bf16.msra.mxu1 %v480_v7  ;;  %433 = vmatprep.subr.bf16.mxu0 %v481_v8  ;;  %v497_v24 = vld [vmem:[%s637_s1 + $0x70] sm:$0xff]   ;;  %v501_v28 = vld [vmem:[%s637_s1 + $0x78] sm:$0xff]   ;;  %v21_v32 = vld [vmem:[%s638_s0] sm:$0xff] }
   0xa   :  { %455 = vmatprep.subr.bf16.mxu1 %v482_v9  ;;  %v498_v25 = vld [vmem:[%s637_s1 + $0xf0] sm:$0xff]   ;;  %v502_v29 = vld [vmem:[%s637_s1 + $0xf8] sm:$0xff]   ;;  %v22_v33 = vld [vmem:[%s638_s0 + $0x8] sm:$0xff]  ;;  %v392_v34 = vcombine.low %v21_v32, %v21_v32  ;;  %v393_v35 = vcombine.high %v21_v32, %v21_v32 }
   0xb   :  { %v499_v26 = vld [vmem:[%s637_s1 + $0x30] sm:$0xff]   ;;  %v503_v30 = vld [vmem:[%s637_s1 + $0x38] sm:$0xff]   ;;  %v394_v36 = vcombine.low %v22_v33, %v22_v33  ;;  %v395_v37 = vcombine.high %v22_v33, %v22_v33  ;;  %v428_v46 = vld [vmem:[%s639_s2] ss:$0 sm:$0xff] }
   0xc   :  { %434 = vmatpush3.bf16.msra.mxu0 %v483_v10  ;;  %v500_v27 = vld [vmem:[%s637_s1 + $0xb0] sm:$0xff]   ;;  %v504_v31 = vld [vmem:[%s637_s1 + $0xb8] sm:$0xff]   ;;  %325 = vmatprep.mubr.bf16.mxu0 %v393_v35 }
   0xd   :  { %456 = vmatpush3.bf16.msra.mxu1 %v484_v11  ;;  %435 = vmatprep.subr.bf16.mxu0 %v485_v12 }
   0xe   :  { %457 = vmatprep.subr.bf16.mxu1 %v486_v13  ;;  %365 = vmatprep.mubr.bf16.mxu1 %v395_v37 }
  0x10   :  { %436 = vmatpush3.bf16.msra.mxu0 %v487_v14 }
  0x11   :  { %458 = vmatpush3.bf16.msra.mxu1 %v488_v15  ;;  %437 = vmatprep.subr.bf16.mxu0 %v489_v16 }
  0x12   :  { %459 = vmatprep.subr.bf16.mxu1 %v490_v17 }
  0x14   :  { %438 = vmatpush3.bf16.msra.mxu0 %v491_v18 }
  0x15   :  { %460 = vmatpush3.bf16.msra.mxu1 %v492_v19  ;;  %439 = vmatprep.subr.bf16.mxu0 %v493_v20 }
  0x16   :  { %461 = vmatprep.subr.bf16.mxu1 %v494_v21 }
  0x18   :  { %440 = vmatpush3.bf16.msra.mxu0 %v495_v22 }
  0x19   :  { %462 = vmatpush3.bf16.msra.mxu1 %v496_v23  ;;  %441 = vmatprep.subr.bf16.mxu0 %v497_v24 }
  0x1a   :  { %463 = vmatprep.subr.bf16.mxu1 %v498_v25 }
  0x1c   :  { %442 = vmatpush3.bf16.msra.mxu0 %v499_v26 }
  0x1d   :  { %464 = vmatpush3.bf16.msra.mxu1 %v500_v27  ;;  %443 = vmatprep.subr.bf16.mxu0 %v501_v28 }
  0x1e   :  { %465 = vmatprep.subr.bf16.mxu1 %v502_v29 }
  0x20   :  { %444 = vmatpush3.bf16.msra.mxu0 %v503_v30 }
  0x21   :  { %466 = vmatpush3.bf16.msra.mxu1 %v504_v31 }
  0x23   :  { %326 = vmatmul.mubr.bf16.vlgmr.msra.gmra.mrb[0].mxu0 %v392_v34 }
  0x24   :  { %366 = vmatmul.mubr.bf16.vlgmr.msra.gmra.mrb[0].mxu1 %v394_v36 }
  0xf6   :  { %v445_v38 = vpop.f32.mrb[0].mxu0 }
  0xf7   :  { %v467_v39 = vpop.f32.mrb[0].mxu1  ;;  %v446_v40 = vpop.f32.mrb[1].mxu0 }
  0xf8   :  { %v468_v41 = vpop.f32.mrb[1].mxu1  ;;  %v447_v42 = vadd.f32 %v446_v40, %v445_v38  ;;  %v448_v44 = vpop.f32.mrb[2].mxu0 }
  0xf9   :  { %v469_v43 = vadd.f32 %v468_v41, %v467_v39  ;;  %v470_v45 = vpop.f32.mrb[2].mxu1  ;;  %v449_v47 = vpop.f32.mrb[3].mxu0 }
  0xfa   :  { %v471_v48 = vpop.f32.mrb[3].mxu1 }
  0xfb   :  { %v368_v49 = vadd.f32 %v469_v43, %v447_v42 }
  0xfd   :  { %v386_v50 = vadd.f32 %v428_v46, %v368_v49 }
  0xff   :  { %387 = vst [vmem:[%s640_s3] sm:$0xff] %v386_v50 }

</bundles_post_ra>
